<compile_context>
chip_gen: v6e
topology: v6e:2x2x1
jax: 0.10.0
libtpu: 0.0.40
codegen_flags: <defaults>
</compile_context>

<pallas_src>
import jax
import jax.numpy as jnp
from jax.experimental import pallas as pl
from jax.experimental.pallas import tpu as pltpu


LEAKY_SLOPE = 0.2
LANES = 128        # TPU lane width; all padded activations / weight columns use this.
BM_MAX = 1024      # max batch rows per grid step (review: sweep 512-1024)
BM_SPLIT_MIN = 256 # above this, split into >=2 tiles so v7x's 2 TCs both get work


def _round_up(x, m):
    return ((x + m - 1) // m) * m


# ----------------------------------------------------------------------------- kernel


def _make_decoder_kernel(nz, ncond, n_layers, matmul_dtype):
    """Build the Pallas kernel body for a fixed (nz, ncond, n_layers) decoder."""
    # Row offsets of each weight chunk inside the packed slab:
    #   chunk 0: [0, nz)              first-layer rows for `input`
    #   chunk 1: [nz, nz+ncond)       first-layer rows for `conditions`
    #   chunk l+1: one 128-row (K-padded) chunk per remaining layer l = 1..n_layers-1
    offs = [0, nz, nz + ncond]
    for _ in range(n_layers - 1):
        offs.append(offs[-1] + LANES)

    mm = matmul_dtype

    def kernel(z_ref, c_ref, w_ref, b_ref, o_ref):
        biases = b_ref[...]  # (n_layers, 128) f32, zero-padded

        # ---- first block: Linear(nz + ncond -> h) + ReLU, concat-free (split-K dots)
        h = (
            jnp.dot(z_ref[...].astype(mm),
                    w_ref[offs[0]:offs[1], :].astype(mm),
                    preferred_element_type=jnp.float32)
            + jnp.dot(c_ref[...].astype(mm),
                      w_ref[offs[1]:offs[2], :].astype(mm),
                      preferred_element_type=jnp.float32)
            + biases[0:1, :]
        )
        h = jnp.maximum(h, 0.0)  # nn.ReLU(True)

        # ---- mid blocks: Linear + LeakyReLU(0.2)  (max form: 2 VALU ops, no select)
        for l in range(1, n_layers - 1):
            h = (
                jnp.dot(h.astype(mm),
                        w_ref[offs[l + 1]:offs[l + 2], :].astype(mm),
                        preferred_element_type=jnp.float32)
                + biases[l:l + 1, :]
            )
            h = jnp.maximum(h, LEAKY_SLOPE * h)

        # ---- final Linear, no activation; write the full lane-dense 128-wide slab.
        l = n_layers - 1
        o_ref[...] = (
            jnp.dot(h.astype(mm),
                    w_ref[offs[l + 1]:offs[l + 2], :].astype(mm),
                    preferred_element_type=jnp.float32)
            + biases[l:l + 1, :]
        )

    return kernel


# ------------------------------------------------------------------------ host wrapper


def _pick_bm(batch):
    """Batch-tile heuristic: big tiles to amortize grid-step overhead, but keep >= 2
    grid steps for mid-size batches so v7x's 2 TensorCores are both used."""
    if batch > BM_MAX:
        return BM_MAX
    if batch >= BM_SPLIT_MIN:
        return _round_up(pl.cdiv(batch, 2), 8)
    return max(8, _round_up(batch, 8))


def decoder2_forward(z, conditions, w_slab, b_slab, n_out,
                     matmul_dtype=jnp.bfloat16, trim_output=True):
    """Pallas-backed Decoder2 forward.

    Returns (batch, n_out) f32, or the raw lane-padded (batch, 128) slab if
    trim_output=False (avoids the extra wrapper-side read+write when the consumer
    can take the padded layout).
    """
    z = z.astype(jnp.float32)
    conditions = conditions.astype(jnp.float32)
    batch, nz = z.shape
    ncond = conditions.shape[1]
    n_layers = b_slab.shape[0]

    bm = _pick_bm(batch)
    pb = _round_up(batch, bm)
    if pb != batch:
        z = jnp.pad(z, ((0, pb - batch), (0, 0)))
        conditions = jnp.pad(conditions, ((0, pb - batch), (0, 0)))

    kernel = _make_decoder_kernel(nz, ncond, n_layers, matmul_dtype)

    out = pl.pallas_call(
        kernel,
        out_shape=jax.ShapeDtypeStruct((pb, LANES), jnp.float32),
        grid=(pb // bm,),
        in_specs=[
            pl.BlockSpec((bm, nz), lambda i: (i, 0)),          # latent rows
            pl.BlockSpec((bm, ncond), lambda i: (i, 0)),       # condition rows
            pl.BlockSpec(w_slab.shape, lambda i: (0, 0)),      # packed weights (resident)
            pl.BlockSpec(b_slab.shape, lambda i: (0, 0)),      # packed biases (resident)
        ],
        out_specs=pl.BlockSpec((bm, LANES), lambda i: (i, 0)),
        compiler_params=pltpu.CompilerParams(
            dimension_semantics=("parallel",),                 # rows independent (no BN)
        ),
    )(z, conditions, w_slab, b_slab)

    if not trim_output:
        return out[:batch]
    return out[:batch, :n_out]


# --------------------------------------------------------------------- params / packing


def make_decoder2_params(key, in_config, ncond):
    """PyTorch-Linear-style init. Weights stored pre-transposed as (in, out), bias (1, out)."""
    nz = in_config[-1]['out']
    dims = [(nz + ncond, in_config[-1]['in'])]
    dims += [(cfg['out'], cfg['in']) for cfg in in_config[::-1][1:-1]]
    dims.append((in_config[1]['in'], in_config[0]['in']))

    params = []
    keys = jax.random.split(key, 2 * len(dims))
    for l, (fan_in, fan_out) in enumerate(dims):
        bound = 1.0 / (float(fan_in) ** 0.5)
        w = jax.random.uniform(keys[2 * l], (fan_in, fan_out), jnp.float32, -bound, bound)
        b = jax.random.uniform(keys[2 * l + 1], (1, fan_out), jnp.float32, -bound, bound)
        params.append((w, b))
    return params


def pack_params(params, nz, ncond):
    """Pack all layer weights into one lane-padded f32 slab and all biases into (L,128).

    The slab is kept f32 (the in-kernel dot operands are cast to bf16); storing it bf16
    would only save ~100 KiB of one-time DMA and would need 16-row-aligned chunk starts.
    """
    # TODO(synk): packing assumes 8-aligned nz/ncond and layer widths <= 128; wider layers
    #             would need N/K tiling over multiple slabs (256-lane N chunks on v6e/v7x).
    assert nz % 8 == 0 and ncond % 8 == 0, "packing assumes 8-aligned latent/condition dims"
    n_layers = len(params)
    w0, _ = params[0]
    assert w0.shape[0] == nz + ncond

    chunks = [w0[:nz], w0[nz:nz + ncond]]          # first layer, split for concat-free dot
    for (w, _) in params[1:]:
        assert w.shape[0] <= LANES and w.shape[1] <= LANES, "layer wider than 128 lanes"
        chunks.append(w)
    assert w0.shape[1] <= LANES

    padded = []
    for idx, w in enumerate(chunks):
        fan_in, fan_out = w.shape
        rows = fan_in if idx < 2 else LANES        # hidden layers: pad K to 128 (acts are 128-wide)
        wp = jnp.zeros((rows, LANES), jnp.float32).at[:fan_in, :fan_out].set(w)
        padded.append(wp)
    w_slab = jnp.concatenate(padded, axis=0)

    b_slab = jnp.zeros((n_layers, LANES), jnp.float32)
    for l, (_, b) in enumerate(params):
        b_slab = b_slab.at[l, :b.shape[-1]].set(b[0])
    return w_slab, b_slab


# ------------------------------------------------------------------------- JAX reference


def decoder2_reference(z, conditions, params):
    """Pure-JAX reference matching the PyTorch Decoder2 forward exactly (f32)."""
    h = jnp.concatenate([z, conditions], axis=-1).astype(jnp.float32)
    w0, b0 = params[0]
    h = jnp.maximum(h @ w0 + b0, 0.0)
    for (w, b) in params[1:-1]:
        y = h @ w + b
        h = jnp.where(y >= 0, y, LEAKY_SLOPE * y)
    w, b = params[-1]
    return h @ w + b


# --------------------------------------------------------------------------------- main


if __name__ == "__main__":
    # Small encoder config consistent with the module: 4 dense layers, latent nz=16.
    in_config = [
        {'in': 48, 'out': 128},
        {'in': 128, 'out': 64},
        {'in': 64, 'out': 32},
        {'in': 32, 'out': 16},
    ]
    ncond = 8
    nz = in_config[-1]['out']          # 16
    n_out = in_config[0]['in']         # 48

    key = jax.random.PRNGKey(0)
    kz, kc, kp, kz2, kc2 = jax.random.split(key, 5)

    params = make_decoder2_params(kp, in_config, ncond)
    w_slab, b_slab = pack_params(params, nz, ncond)

    # --- small batch, f32 matmuls: exact semantics vs. the PyTorch-equivalent reference.
    batch = 8
    z = jax.random.normal(kz, (batch, nz), jnp.float32)
    conditions = jax.random.normal(kc, (batch, ncond), jnp.float32)
    out_f32 = decoder2_forward(z, conditions, w_slab, b_slab, n_out,
                               matmul_dtype=jnp.float32)
    out_f32 = jax.block_until_ready(out_f32)
    ref = decoder2_reference(z, conditions, params)
    assert out_f32.shape == ref.shape
    assert jnp.allclose(out_f32, ref, atol=1e-4, rtol=1e-4), (
        "f32 max abs err = %g" % float(jnp.max(jnp.abs(out_f32 - ref))))

    # --- larger unaligned batch, bf16 MXU operands (default): exercises padding + the
    #     2-step "parallel" grid (v7x dual-TC path); tolerance relaxed for bf16 operands.
    batch2 = 1000
    z2 = jax.random.normal(kz2, (batch2, nz), jnp.float32)
    c2 = jax.random.normal(kc2, (batch2, ncond), jnp.float32)
    out_bf16 = jax.block_until_ready(
        decoder2_forward(z2, c2, w_slab, b_slab, n_out))
    ref2 = decoder2_reference(z2, c2, params)
    assert out_bf16.shape == ref2.shape
    assert jnp.allclose(out_bf16, ref2, atol=1e-1, rtol=5e-2), (
        "bf16 max abs err = %g" % float(jnp.max(jnp.abs(out_bf16 - ref2))))

    print("KERNEL_OK")
</pallas_src>

<mosaic_0001>
module attributes {stable_mosaic.version = 11 : i64} {
  func.func @kernel(%arg0: i32, %arg1: memref<8x16xf32, #tpu.memory_space<vmem>>, %arg2: memref<8x8xf32, #tpu.memory_space<vmem>>, %arg3: memref<408x128xf32, #tpu.memory_space<vmem>>, %arg4: memref<4x128xf32, #tpu.memory_space<vmem>>, %arg5: memref<8x128xf32, #tpu.memory_space<vmem>>) attributes {dimension_semantics = [#tpu.dimension_semantics<parallel>], iteration_bounds = array<i64: 1>, scalar_prefetch = 0 : i64, scratch_operands = 0 : i64, tpu.core_type = #tpu.core_type<tc>, window_params = [{transform_indices = @transform_0, window_bounds = array<i64: 8, 16>}, {transform_indices = @transform_1, window_bounds = array<i64: 8, 8>}, {pipeline_mode = #tpu.pipeline_mode<synchronous>, transform_indices = @transform_2, window_bounds = array<i64: 408, 128>}, {pipeline_mode = #tpu.pipeline_mode<synchronous>, transform_indices = @transform_3, window_bounds = array<i64: 4, 128>}, {transform_indices = @transform_4, window_bounds = array<i64: 8, 128>}]} {
    %c0 = arith.constant 0 : index
    %c0_0 = arith.constant 0 : index
    %0 = vector.load %arg4[%c0, %c0_0] : memref<4x128xf32, #tpu.memory_space<vmem>>, vector<4x128xf32>
    %c0_1 = arith.constant 0 : index
    %c0_2 = arith.constant 0 : index
    %1 = vector.load %arg1[%c0_1, %c0_2] : memref<8x16xf32, #tpu.memory_space<vmem>>, vector<8x16xf32>
    %c0_3 = arith.constant 0 : index
    %c0_4 = arith.constant 0 : index
    %2 = vector.load %arg3[%c0_3, %c0_4] : memref<408x128xf32, #tpu.memory_space<vmem>>, vector<16x128xf32>
    %cst = arith.constant dense<0.000000e+00> : vector<8x128xf32>
    %3 = tpu.matmul %1, %2, %cst {dimension_numbers = #tpu.dot_dimension_numbers<[1], [0], [0], [1], [0, 0, 1, 1], [], []>} : vector<8x16xf32>, vector<16x128xf32>, vector<8x128xf32> -> vector<8x128xf32>
    %c0_5 = arith.constant 0 : index
    %c0_6 = arith.constant 0 : index
    %4 = vector.load %arg2[%c0_5, %c0_6] : memref<8x8xf32, #tpu.memory_space<vmem>>, vector<8x8xf32>
    %c16 = arith.constant 16 : index
    %c0_7 = arith.constant 0 : index
    %5 = vector.load %arg3[%c16, %c0_7] : memref<408x128xf32, #tpu.memory_space<vmem>>, vector<8x128xf32>
    %cst_8 = arith.constant dense<0.000000e+00> : vector<8x128xf32>
    %6 = tpu.matmul %4, %5, %cst_8 {dimension_numbers = #tpu.dot_dimension_numbers<[1], [0], [0], [1], [0, 0, 1, 1], [], []>} : vector<8x8xf32>, vector<8x128xf32>, vector<8x128xf32> -> vector<8x128xf32>
    %7 = arith.addf %3, %6 : vector<8x128xf32>
    %8 = vector.extract_strided_slice %0 {offsets = [0, 0], sizes = [1, 128], strides = [1, 1]} : vector<4x128xf32> to vector<1x128xf32>
    %9 = vector.broadcast %8 : vector<1x128xf32> to vector<8x128xf32>
    %10 = arith.addf %7, %9 : vector<8x128xf32>
    %cst_9 = arith.constant 0.000000e+00 : f32
    %11 = vector.broadcast %cst_9 : f32 to vector<8x128xf32>
    %12 = arith.maximumf %10, %11 : vector<8x128xf32>
    %c24 = arith.constant 24 : index
    %c0_10 = arith.constant 0 : index
    %13 = vector.load %arg3[%c24, %c0_10] : memref<408x128xf32, #tpu.memory_space<vmem>>, vector<128x128xf32>
    %cst_11 = arith.constant dense<0.000000e+00> : vector<8x128xf32>
    %14 = tpu.matmul %12, %13, %cst_11 {dimension_numbers = #tpu.dot_dimension_numbers<[1], [0], [0], [1], [0, 0, 1, 1], [], []>} : vector<8x128xf32>, vector<128x128xf32>, vector<8x128xf32> -> vector<8x128xf32>
    %15 = vector.extract_strided_slice %0 {offsets = [1, 0], sizes = [1, 128], strides = [1, 1]} : vector<4x128xf32> to vector<1x128xf32>
    %16 = vector.broadcast %15 : vector<1x128xf32> to vector<8x128xf32>
    %17 = arith.addf %14, %16 : vector<8x128xf32>
    %cst_12 = arith.constant 2.000000e-01 : f32
    %18 = vector.broadcast %cst_12 : f32 to vector<8x128xf32>
    %19 = arith.mulf %18, %17 : vector<8x128xf32>
    %20 = arith.maximumf %17, %19 : vector<8x128xf32>
    %c152 = arith.constant 152 : index
    %c0_13 = arith.constant 0 : index
    %21 = vector.load %arg3[%c152, %c0_13] : memref<408x128xf32, #tpu.memory_space<vmem>>, vector<128x128xf32>
    %cst_14 = arith.constant dense<0.000000e+00> : vector<8x128xf32>
    %22 = tpu.matmul %20, %21, %cst_14 {dimension_numbers = #tpu.dot_dimension_numbers<[1], [0], [0], [1], [0, 0, 1, 1], [], []>} : vector<8x128xf32>, vector<128x128xf32>, vector<8x128xf32> -> vector<8x128xf32>
    %23 = vector.extract_strided_slice %0 {offsets = [2, 0], sizes = [1, 128], strides = [1, 1]} : vector<4x128xf32> to vector<1x128xf32>
    %24 = vector.broadcast %23 : vector<1x128xf32> to vector<8x128xf32>
    %25 = arith.addf %22, %24 : vector<8x128xf32>
    %cst_15 = arith.constant 2.000000e-01 : f32
    %26 = vector.broadcast %cst_15 : f32 to vector<8x128xf32>
    %27 = arith.mulf %26, %25 : vector<8x128xf32>
    %28 = arith.maximumf %25, %27 : vector<8x128xf32>
    %c280 = arith.constant 280 : index
    %c0_16 = arith.constant 0 : index
    %29 = vector.load %arg3[%c280, %c0_16] : memref<408x128xf32, #tpu.memory_space<vmem>>, vector<128x128xf32>
    %cst_17 = arith.constant dense<0.000000e+00> : vector<8x128xf32>
    %30 = tpu.matmul %28, %29, %cst_17 {dimension_numbers = #tpu.dot_dimension_numbers<[1], [0], [0], [1], [0, 0, 1, 1], [], []>} : vector<8x128xf32>, vector<128x128xf32>, vector<8x128xf32> -> vector<8x128xf32>
    %31 = vector.extract_strided_slice %0 {offsets = [3, 0], sizes = [1, 128], strides = [1, 1]} : vector<4x128xf32> to vector<1x128xf32>
    %32 = vector.broadcast %31 : vector<1x128xf32> to vector<8x128xf32>
    %33 = arith.addf %30, %32 : vector<8x128xf32>
    %c0_18 = arith.constant 0 : index
    %c0_19 = arith.constant 0 : index
    %34 = vector.load %arg5[%c0_18, %c0_19] : memref<8x128xf32, #tpu.memory_space<vmem>>, vector<8x128xf32>
    tpu.vector_store %arg5[%c0_18, %c0_19], %33 {strides = array<i32>} : memref<8x128xf32, #tpu.memory_space<vmem>>, vector<8x128xf32>,
    return
  }
  func.func @transform_0(%arg0: i32) -> (i32, i32) {
    %c0_i32 = arith.constant 0 : i32
    %c0_i32_0 = arith.constant 0 : i32
    return %arg0, %c0_i32 : i32, i32
  }
  func.func @transform_1(%arg0: i32) -> (i32, i32) {
    %c0_i32 = arith.constant 0 : i32
    %c0_i32_0 = arith.constant 0 : i32
    return %arg0, %c0_i32 : i32, i32
  }
  func.func @transform_2(%arg0: i32) -> (i32, i32) {
    %c0_i32 = arith.constant 0 : i32
    %c0_i32_0 = arith.constant 0 : i32
    %c0_i32_1 = arith.constant 0 : i32
    return %c0_i32, %c0_i32_0 : i32, i32
  }
  func.func @transform_3(%arg0: i32) -> (i32, i32) {
    %c0_i32 = arith.constant 0 : i32
    %c0_i32_0 = arith.constant 0 : i32
    %c0_i32_1 = arith.constant 0 : i32
    return %c0_i32, %c0_i32_0 : i32, i32
  }
  func.func @transform_4(%arg0: i32) -> (i32, i32) {
    %c0_i32 = arith.constant 0 : i32
    %c0_i32_0 = arith.constant 0 : i32
    return %arg0, %c0_i32 : i32, i32
  }
}

</mosaic_0001>

<bundles_post_ra>
// kernel: tpu_custom_call.1
= control target key start
LH: loop header
LB: loop body
LE: loop exit
PB: predicated region body
PF: predicated region fallthrough
CT: control target
= control target key end

     0   :  { %9 = vsyncpa [#allocation3], 0  ;;  %s896_s0 = inlined_call_operand.hbm [shape: f32[8,16], index: 0, kind: input, shape index: {}]   ;;  %s897_s1 = inlined_call_operand.hbm [shape: f32[8,8], index: 1, kind: input, shape index: {}]   ;;  %s898_s2 = inlined_call_operand.hbm [shape: f32[408,128], index: 2, kind: input, shape index: {}]   ;;  %s899_s3 = inlined_call_operand.vmem [shape: f32[4,128], index: 3, kind: input, shape index: {}]   ;;  %s900_s4 = inlined_call_operand.hbm [shape: f32[8,128], index: 4, kind: output, shape index: {}]  }
   0x1   :  { %10 = vsyncpa [#allocation6], 0 }
   0x2   :  { %11 = vsyncpa [#allocation4], 0  ;;  %s775_s15 = smov [#allocation5]   ;;  %s776_s17 = smov [#allocation2]  }
   0x3   :  { %s28_s16 = sshll.u32 %s775_s15, 4  ;;  %s18_s18 = sshll.u32 %s776_s17, 4  ;;  %s29_s16 = int_to_ptr.vmem [resolvable:$true] %s28_s16  ;;  %s19_s18 = int_to_ptr.vmem [resolvable:$true] %s18_s18 }
   0x4   :  { %s697_s19 = scalar_lea.vmem %s29_s16, 128  ;;  %p702_p1 = scmp.lt.s32.totalorder %s29_s16, %s29_s16 }
   0x5   :  { %p698_p0 = scmp.ne.s32.totalorder %s29_s16, %s697_s19  ;;  %p703_p2 = scmp.lt.s32.totalorder %s697_s19, %s697_s19 }
   0x7   :  { %p704_p3 = por %p703_p2, %p702_p1 }
   0x9   :  { %p705_p4 = pnand %p704_p3, %p698_p0 }
   0xb   :  { %708 = shalt.err (!%p705_p4)
}
   0xc   :  { %31 = dma.hbm_to_vmem [thread:$0]  %s897_s1, 128, %s29_s16, [#allocation6]  }
   0xd   :  { %s717_s22 = scalar_lea.vmem %s19_s18, 128  ;;  %p722_p6 = scmp.lt.s32.totalorder %s19_s18, %s19_s18 }
   0xe   :  { %p718_p5 = scmp.ne.s32.totalorder %s19_s18, %s717_s22  ;;  %p723_p7 = scmp.lt.s32.totalorder %s717_s22, %s717_s22 }
  0x10   :  { %p724_p8 = por %p723_p7, %p722_p6 }
  0x12   :  { %p725_p9 = pnand %p724_p8, %p718_p5 }
  0x14   :  { %728 = shalt.err (!%p725_p9)
}
  0x15   :  { %21 = dma.hbm_to_vmem [thread:$0]  %s896_s0, 128, %s19_s18, [#allocation3]  }
  0x16   :  { %s777_s25 = smov [#allocation7]  }
  0x17   :  { %s37_s26 = sshll.u32 %s777_s25, 4  ;;  %s38_s26 = int_to_ptr.vmem [resolvable:$true] %s37_s26 }
  0x18   :  { %s737_s27 = scalar_lea.vmem %s38_s26, 6528  ;;  %p742_p11 = scmp.lt.s32.totalorder %s38_s26, %s38_s26 }
  0x19   :  { %p738_p10 = scmp.ne.s32.totalorder %s38_s26, %s737_s27  ;;  %p743_p12 = scmp.lt.s32.totalorder %s737_s27, %s737_s27 }
  0x1b   :  { %p744_p13 = por %p743_p12, %p742_p11 }
  0x1d   :  { %p745_p0 = pnand %p744_p13, %p738_p10 }
  0x1f   :  { %748 = shalt.err (!%p745_p0)
}
  0x20   :  { %s778_s1 = smov 128   ;;  %s779_s28 = smov 8  }
  0x21   :  { %43 = dma.hbm_to_vmem [thread:$0]  %s898_s2, 6528, %s38_s26, [#allocation6], %s778_s1, %s778_s1, %s779_s28  }
  0x22   :  { %769 = dma.done.wait [#allocation3], 128  }
  0x23   :  { %770 = vsyncadd [#allocation3], 4294967168 }
  0x24   :  { %771 = dma.done.wait [#allocation6], 6656  }
  0x25   :  { %772 = vsyncadd [#allocation6], 4294960640  ;;  %v780_v0 = vmov 0.0   ;;  %vm781_vm0 = vmmov 0   ;;  %vm61_vm1 = vcmask 64512   ;;  %v60_v1 = vld [vmem:[#allocation7 + $0x10] sm:$0xff]  ;;  %v209_v34 = vlaneseq }
  0x26   :  { %564 = vmatprep.subr.mxu1 %v780_v0  ;;  %566 = vmatprep.mubr.msk.f32.mxu1 %vm781_vm0, %v780_v0  ;;  %v59_v2 = vld [vmem:[#allocation5] sm:$0xff]  ;;  %v58_v3 = vld [vmem:[#allocation7 + $0x8] sm:$0xff]  ;;  %v230_v4 = vld [vmem:[#allocation7 + $0x90] sm:$0xff]  ;;  %vm135_vm2 = vcmask 130048  }
  0x27   :  { %576 = vmatprep.subr.mxu0 %v780_v0  ;;  %608 = vmatprep.mubr.msk.f32.mxu0 %vm781_vm0, %v780_v0  ;;  %v57_v5 = vld [vmem:[#allocation7] sm:$0xff]  ;;  %v56_v6 = vld [vmem:[#allocation2] sm:$0xff]  ;;  %v229_v7 = vld [vmem:[#allocation7 + $0x88] sm:$0xff]  ;;  %v858_v35 = vshrl.u32 %v209_v34, 7 }
  0x28   :  { %565 = vmatpush3.msra.mxu1 %v60_v1  ;;  %577 = vmatpush3.msra.mxu0 %v230_v4  ;;  %v228_v8 = vld [vmem:[#allocation7 + $0x80] sm:$0xff]  ;;  %v227_v9 = vld [vmem:[#allocation7 + $0x78] sm:$0xff]  ;;  %v226_v10 = vld [vmem:[#allocation7 + $0x70] sm:$0xff] }
  0x29   :  { %567 = vmatmul.mubr.msk.f32.vlgmr.msra.gmra.mxu1 %vm61_vm1, %v59_v2  ;;  %569 = vmatprep.subr.mxu1 %v780_v0  ;;  %v225_v11 = vld [vmem:[#allocation7 + $0x68] sm:$0xff]  ;;  %v224_v12 = vld [vmem:[#allocation7 + $0x60] sm:$0xff]  ;;  %v223_v13 = vld [vmem:[#allocation7 + $0x58] sm:$0xff]  ;;  %v211_v36 = vsub.s32 0, %v858_v35  ;;  %v233_v62 = vsub.s32 1, %v858_v35 }
  0x2a   :  { %570 = vmatpush3.msra.mxu1 %v58_v3  ;;  %573 = vmatprep.mubr.msk.f32.mxu1 %vm781_vm0, %v780_v0  ;;  %v222_v14 = vld [vmem:[#allocation7 + $0x50] sm:$0xff]  ;;  %v221_v15 = vld [vmem:[#allocation7 + $0x48] sm:$0xff]  ;;  %v220_v16 = vld [vmem:[#allocation7 + $0x40] sm:$0xff] }
  0x2b   :  { %571 = vmatprep.subr.mxu1 %v780_v0  ;;  %578 = vmatprep.subr.mxu0 %v780_v0  ;;  %v219_v17 = vld [vmem:[#allocation7 + $0x38] sm:$0xff]  ;;  %v218_v18 = vld [vmem:[#allocation7 + $0x30] sm:$0xff]  ;;  %v217_v19 = vld [vmem:[#allocation7 + $0x28] sm:$0xff] }
  0x2c   :  { %572 = vmatpush3.msra.mxu1 %v57_v5  ;;  %579 = vmatpush3.msra.mxu0 %v229_v7  ;;  %v216_v20 = vld [vmem:[#allocation7 + $0x20] sm:$0xff]  ;;  %v215_v21 = vld [vmem:[#allocation7 + $0x18] sm:$0xff]  ;;  %v322_v22 = vld [vmem:[#allocation7 + $0x110] sm:$0xff] }
  0x2d   :  { %574 = vmatmul.mubr.msk.f32.vlgmr.msra.gmra.mxu1 %vm135_vm2, %v56_v6  ;;  %580 = vmatprep.subr.mxu0 %v780_v0  ;;  %v321_v23 = vld [vmem:[#allocation7 + $0x108] sm:$0xff]  ;;  %v320_v24 = vld [vmem:[#allocation7 + $0x100] sm:$0xff]  ;;  %v319_v25 = vld [vmem:[#allocation7 + $0xf8] sm:$0xff] }
  0x2e   :  { %611 = vmatprep.subr.mxu1 %v780_v0  ;;  %581 = vmatpush3.msra.mxu0 %v228_v8  ;;  %v318_v26 = vld [vmem:[#allocation7 + $0xf0] sm:$0xff]  ;;  %v317_v27 = vld [vmem:[#allocation7 + $0xe8] sm:$0xff]  ;;  %v316_v28 = vld [vmem:[#allocation7 + $0xe0] sm:$0xff] }
  0x2f   :  { %643 = vmatprep.mubr.msk.f32.mxu1 %vm781_vm0, %v780_v0  ;;  %582 = vmatprep.subr.mxu0 %v780_v0  ;;  %v315_v29 = vld [vmem:[#allocation7 + $0xd8] sm:$0xff]  ;;  %v314_v30 = vld [vmem:[#allocation7 + $0xd0] sm:$0xff]  ;;  %v313_v31 = vld [vmem:[#allocation7 + $0xc8] sm:$0xff] }
  0x30   :  { %583 = vmatpush3.msra.mxu0 %v227_v9  ;;  %612 = vmatpush3.msra.mxu1 %v322_v22  ;;  %v312_v32 = vld [vmem:[#allocation7 + $0xc0] sm:$0xff]  ;;  %v311_v33 = vld [vmem:[#allocation7 + $0xb8] sm:$0xff]  ;;  %v864_v38 = vld [vmem:[%s899_s3] sm:$0xf]  ;;  %s782_s3 = smov [#allocation8]  }
  0x31   :  { %584 = vmatprep.subr.mxu0 %v780_v0  ;;  %613 = vmatprep.subr.mxu1 %v780_v0  ;;  %v212_v40 = vrot.slane %v864_v38, %v211_v36  ;;  %v310_v46 = vld [vmem:[#allocation7 + $0xb0] sm:$0xff]  ;;  %v309_v47 = vld [vmem:[#allocation7 + $0xa8] sm:$0xff]  ;;  %v308_v48 = vld [vmem:[#allocation7 + $0xa0] sm:$0xff]  ;;  %v234_v63 = vrot.slane %v864_v38, %v233_v62  ;;  %s496_s5 = sshll.u32 %s782_s3, 4  ;;  %s497_s5 = int_to_ptr.vmem [resolvable:$true] %s496_s5 }
  0x32   :  { %585 = vmatpush3.msra.mxu0 %v226_v10  ;;  %614 = vmatpush3.msra.mxu1 %v321_v23  ;;  %v307_v49 = vld [vmem:[#allocation7 + $0x98] sm:$0xff]  ;;  %v414_v50 = vld [vmem:[#allocation7 + $0x190] sm:$0xff]  ;;  %v413_v51 = vld [vmem:[#allocation7 + $0x188] sm:$0xff]  ;;  %v325_v10 = vsub.s32 2, %v858_v35  ;;  %s749_s6 = scalar_lea.vmem %s497_s5, 128  ;;  %p754_p2 = scmp.lt.s32.totalorder %s497_s5, %s497_s5 }
  0x33   :  { %586 = vmatprep.subr.mxu0 %v780_v0  ;;  %615 = vmatprep.subr.mxu1 %v780_v0  ;;  %v412_v52 = vld [vmem:[#allocation7 + $0x180] sm:$0xff]  ;;  %v411_v53 = vld [vmem:[#allocation7 + $0x178] sm:$0xff]  ;;  %v410_v54 = vld [vmem:[#allocation7 + $0x170] sm:$0xff]  ;;  %p750_p1 = scmp.ne.s32.totalorder %s497_s5, %s749_s6  ;;  %p755_p3 = scmp.lt.s32.totalorder %s749_s6, %s749_s6 }
  0x34   :  { %587 = vmatpush3.msra.mxu0 %v225_v11  ;;  %616 = vmatpush3.msra.mxu1 %v320_v24  ;;  %v409_v55 = vld [vmem:[#allocation7 + $0x168] sm:$0xff]  ;;  %v408_v56 = vld [vmem:[#allocation7 + $0x160] sm:$0xff]  ;;  %v407_v57 = vld [vmem:[#allocation7 + $0x158] sm:$0xff]  ;;  %v326_v11 = vrot.slane %v864_v38, %v325_v10 }
  0x35   :  { %588 = vmatprep.subr.mxu0 %v780_v0  ;;  %617 = vmatprep.subr.mxu1 %v780_v0  ;;  %v406_v58 = vld [vmem:[#allocation7 + $0x150] sm:$0xff]  ;;  %v405_v59 = vld [vmem:[#allocation7 + $0x148] sm:$0xff]  ;;  %v404_v60 = vld [vmem:[#allocation7 + $0x140] sm:$0xff]  ;;  %p756_p4 = por %p755_p3, %p754_p2 }
  0x36   :  { %589 = vmatpush3.msra.mxu0 %v224_v12  ;;  %618 = vmatpush3.msra.mxu1 %v319_v25  ;;  %v403_v61 = vld [vmem:[#allocation7 + $0x138] sm:$0xff]  ;;  %v402_v6 = vld [vmem:[#allocation7 + $0x130] sm:$0xff]  ;;  %v401_v7 = vld [vmem:[#allocation7 + $0x128] sm:$0xff] }
  0x37   :  { %590 = vmatprep.subr.mxu0 %v780_v0  ;;  %619 = vmatprep.subr.mxu1 %v780_v0  ;;  %v400_v8 = vld [vmem:[#allocation7 + $0x120] sm:$0xff]  ;;  %v399_v9 = vld [vmem:[#allocation7 + $0x118] sm:$0xff]  ;;  %p757_p5 = pnand %p756_p4, %p750_p1 }
  0x38   :  { %591 = vmatpush3.msra.mxu0 %v223_v13  ;;  %620 = vmatpush3.msra.mxu1 %v318_v26 }
  0x39   :  { %592 = vmatprep.subr.mxu0 %v780_v0  ;;  %621 = vmatprep.subr.mxu1 %v780_v0 }
  0x3a   :  { %593 = vmatpush3.msra.mxu0 %v222_v14  ;;  %622 = vmatpush3.msra.mxu1 %v317_v27 }
  0x3b   :  { %594 = vmatprep.subr.mxu0 %v780_v0  ;;  %623 = vmatprep.subr.mxu1 %v780_v0 }
  0x3c   :  { %595 = vmatpush3.msra.mxu0 %v221_v15  ;;  %624 = vmatpush3.msra.mxu1 %v316_v28 }
  0x3d   :  { %596 = vmatprep.subr.mxu0 %v780_v0  ;;  %625 = vmatprep.subr.mxu1 %v780_v0 }
  0x3e   :  { %597 = vmatpush3.msra.mxu0 %v220_v16  ;;  %626 = vmatpush3.msra.mxu1 %v315_v29 }
  0x3f   :  { %598 = vmatprep.subr.mxu0 %v780_v0  ;;  %627 = vmatprep.subr.mxu1 %v780_v0 }
  0x40   :  { %599 = vmatpush3.msra.mxu0 %v219_v17  ;;  %628 = vmatpush3.msra.mxu1 %v314_v30  ;;  %v417_v17 = vsub.s32 3, %v858_v35 }
  0x41   :  { %600 = vmatprep.subr.mxu0 %v780_v0  ;;  %629 = vmatprep.subr.mxu1 %v780_v0 }
  0x42   :  { %601 = vmatpush3.msra.mxu0 %v218_v18  ;;  %630 = vmatpush3.msra.mxu1 %v313_v31  ;;  %v418_v18 = vrot.slane %v864_v38, %v417_v17 }
  0x43   :  { %602 = vmatprep.subr.mxu0 %v780_v0  ;;  %631 = vmatprep.subr.mxu1 %v780_v0 }
  0x44   :  { %603 = vmatpush3.msra.mxu0 %v217_v19  ;;  %632 = vmatpush3.msra.mxu1 %v312_v32 }
  0x45   :  { %604 = vmatprep.subr.mxu0 %v780_v0  ;;  %633 = vmatprep.subr.mxu1 %v780_v0 }
  0x46   :  { %605 = vmatpush3.msra.mxu0 %v216_v20  ;;  %634 = vmatpush3.msra.mxu1 %v311_v33 }
  0x47   :  { %606 = vmatprep.subr.mxu0 %v780_v0  ;;  %635 = vmatprep.subr.mxu1 %v780_v0 }
  0x48   :  { %607 = vmatpush3.msra.mxu0 %v215_v21  ;;  %636 = vmatpush3.msra.mxu1 %v310_v46 }
  0x49   :  { %646 = vmatprep.subr.mxu0 %v780_v0  ;;  %637 = vmatprep.subr.mxu1 %v780_v0 }
  0x4a   :  { %638 = vmatpush3.msra.mxu1 %v309_v47 }
  0x4b   :  { %639 = vmatprep.subr.mxu1 %v780_v0 }
  0x4c   :  { %640 = vmatpush3.msra.mxu1 %v308_v48 }
  0x4d   :  { %641 = vmatprep.subr.mxu1 %v780_v0 }
  0x4e   :  { %642 = vmatpush3.msra.mxu1 %v307_v49 }
  0xe9   :  { %v131_v37 = vpop.f32.mrf.mxu1 }
  0xeb   :  { %v568_v39 = vpop.f32.mrf.mxu1 }
  0xed   :  { %v205_v41 = vpop.f32.mrf.mxu1 }
  0xee   :  { %v206_v42 = vadd.f32 %v205_v41, %v131_v37 }
  0xef   :  { %v575_v43 = vpop.f32.mrf.mxu1 }
  0xf0   :  { %v213_v44 = vadd.f32 %v212_v40, %v206_v42 }
  0xf2   :  { %v214_v45 = vmax.f32 %v213_v44, 0.0 }
  0xf4   :  { %609 = vmatmul.mubr.f32.vlgmr.msra.gmra.mxu0 %v214_v45 }
  0xf5   :  { %678 = vmatprep.mubr.msk.f32.mxu0 %vm781_vm0, %v780_v0  ;;  %647 = vmatpush3.msra.mxu0 %v414_v50 }
  0xf6   :  { %648 = vmatprep.subr.mxu0 %v780_v0 }
  0xf7   :  { %649 = vmatpush3.msra.mxu0 %v413_v51 }
  0xf8   :  { %650 = vmatprep.subr.mxu0 %v780_v0 }
  0xf9   :  { %651 = vmatpush3.msra.mxu0 %v412_v52 }
  0xfa   :  { %652 = vmatprep.subr.mxu0 %v780_v0 }
  0xfb   :  { %653 = vmatpush3.msra.mxu0 %v411_v53 }
  0xfc   :  { %654 = vmatprep.subr.mxu0 %v780_v0 }
  0xfd   :  { %655 = vmatpush3.msra.mxu0 %v410_v54 }
  0xfe   :  { %656 = vmatprep.subr.mxu0 %v780_v0 }
  0xff   :  { %657 = vmatpush3.msra.mxu0 %v409_v55 }
 0x100   :  { %658 = vmatprep.subr.mxu0 %v780_v0 }
 0x101   :  { %659 = vmatpush3.msra.mxu0 %v408_v56 }
 0x102   :  { %660 = vmatprep.subr.mxu0 %v780_v0 }
 0x103   :  { %661 = vmatpush3.msra.mxu0 %v407_v57 }
 0x104   :  { %662 = vmatprep.subr.mxu0 %v780_v0 }
 0x105   :  { %663 = vmatpush3.msra.mxu0 %v406_v58 }
 0x106   :  { %664 = vmatprep.subr.mxu0 %v780_v0 }
 0x107   :  { %665 = vmatpush3.msra.mxu0 %v405_v59 }
 0x108   :  { %666 = vmatprep.subr.mxu0 %v780_v0 }
 0x109   :  { %667 = vmatpush3.msra.mxu0 %v404_v60 }
 0x10a   :  { %668 = vmatprep.subr.mxu0 %v780_v0 }
 0x10b   :  { %669 = vmatpush3.msra.mxu0 %v403_v61 }
 0x10c   :  { %670 = vmatprep.subr.mxu0 %v780_v0 }
 0x10d   :  { %671 = vmatpush3.msra.mxu0 %v402_v6 }
 0x10e   :  { %672 = vmatprep.subr.mxu0 %v780_v0 }
 0x10f   :  { %673 = vmatpush3.msra.mxu0 %v401_v7 }
 0x110   :  { %674 = vmatprep.subr.mxu0 %v780_v0 }
 0x111   :  { %675 = vmatpush3.msra.mxu0 %v400_v8 }
 0x112   :  { %676 = vmatprep.subr.mxu0 %v780_v0 }
 0x113   :  { %677 = vmatpush3.msra.mxu0 %v399_v9 }
 0x1b4   :  { %v301_v1 = vpop.f32.mrf.mxu0 }
 0x1b5   :  { %v302_v2 = vadd.f32 %v301_v1, %v234_v63 }
 0x1b6   :  { %v610_v3 = vpop.f32.mrf.mxu0 }
 0x1b7   :  { %v305_v4 = vmul.f32 0.2, %v302_v2 }
 0x1b9   :  { %v306_v5 = vmax.f32 %v302_v2, %v305_v4 }
 0x1bb   :  { %644 = vmatmul.mubr.f32.vlgmr.msra.gmra.mxu1 %v306_v5 }
 0x27b   :  { %v393_v12 = vpop.f32.mrf.mxu1 }
 0x27c   :  { %v394_v13 = vadd.f32 %v393_v12, %v326_v11 }
 0x27d   :  { %v645_v14 = vpop.f32.mrf.mxu1 }
 0x27e   :  { %v397_v15 = vmul.f32 0.2, %v394_v13 }
 0x280   :  { %v398_v16 = vmax.f32 %v394_v13, %v397_v15 }
 0x282   :  { %679 = vmatmul.mubr.f32.vlgmr.msra.gmra.mxu0 %v398_v16 }
 0x342   :  { %v485_v19 = vpop.f32.mrf.mxu0 }
 0x343   :  { %v486_v0 = vadd.f32 %v485_v19, %v418_v18 }
 0x344   :  { %v680_v20 = vpop.f32.mrf.mxu0 }
 0x345   :  { %489 = vst [vmem:[#allocation8] sm:$0xff] %v486_v0 }
 0x346   :  { %760 = shalt.err (!%p757_p5)
}
 0x347   :  { %499 = dma.vmem_to_hbm [thread:$0]  %s497_s5, 128, %s900_s4, [#allocation4]  }
 0x348   :  { %773 = dma.done.wait [#allocation4], 128  }
 0x349   :  { %774 = vsyncadd [#allocation4], 4294967168 }
 0x34a   :  { %503 = vsyncpa [#allocation3], 1 }
 0x34b   :  { %504 = vsyncpa [#allocation6], 1 }
 0x34c   :  { %505 = vsyncpa [#allocation4], 1 }

</bundles_post_ra>
